<compile_context>
chip_gen: v7x
topology: tpu7x:2x2x1
jax: 0.10.0
libtpu: 0.0.40
codegen_flags: <defaults>
</compile_context>

<pallas_src>
import functools

import jax
import jax.numpy as jnp
from jax import lax
from jax.experimental import pallas as pl
from jax.experimental.pallas import tpu as pltpu


def _round_up(x, m):
    return (x + m - 1) // m * m


def _lstm_kernel(x_ref, wih_ref, whh_ref, b_ref, wout_ref, bout_ref,
                 out_ref, xg_ref, hist_ref, *, unroll):
    """Whole-sequence LSTM + final projection, single kernel invocation.

    x_ref    : (S0*S1, E)      embedded inputs, all time steps
    wih_ref  : (E,  4*Hp)      input->gate weights (gate-blocked, lane-padded)
    whh_ref  : (Hp, 4*Hp)      hidden->gate weights (gate-blocked, lane-padded)
    b_ref    : (1,  4*Hp)      b_ih + b_hh (gate-blocked, lane-padded)
    wout_ref : (Hp, Tp)        hidden2tag weight (padded)
    bout_ref : (1,  Tp)        hidden2tag bias (padded)
    out_ref  : (S0, Tp)        tag_space of batch row S1-1, every time step
    xg_ref   : (S0, S1, 4*Hp)  scratch: hoisted x-projection of the gates
    hist_ref : (S0, S1, Hp)    scratch: per-step hidden states
    """
    S0, S1, Hp = hist_ref.shape

    # Hoisted, non-recurrent input projection with the bias folded in:
    # one tall MXU matmul for all time steps instead of S0 tiny ones.
    xg = (jnp.dot(x_ref[...], wih_ref[...],
                  preferred_element_type=jnp.float32) + b_ref[...])
    xg_ref[...] = xg.reshape(S0, S1, 4 * Hp)

    def step(t, carry):
        h_prev, c_prev = carry
        gates = xg_ref[t] + jnp.dot(h_prev, whh_ref[...],
                                    preferred_element_type=jnp.float32)
        # Hp == 128*k, so every gate slice is a full, aligned lane tile.
        i_g = jax.nn.sigmoid(gates[:, 0 * Hp:1 * Hp])
        f_g = jax.nn.sigmoid(gates[:, 1 * Hp:2 * Hp])
        g_g = jnp.tanh(gates[:, 2 * Hp:3 * Hp])
        o_g = jax.nn.sigmoid(gates[:, 3 * Hp:4 * Hp])
        c_new = f_g * c_prev + i_g * g_g
        h_new = o_g * jnp.tanh(c_new)
        hist_ref[t] = h_new
        return (h_new, c_new)

    h0 = jnp.zeros((S1, Hp), jnp.float32)
    c0 = jnp.zeros((S1, Hp), jnp.float32)
    lax.fori_loop(0, S0, step, (h0, c0), unroll=unroll)

    # hidden2tag once, after the recurrence, only for batch row S1-1
    # (PyTorch keeps [:, -1, :]); single (S0, Hp) @ (Hp, Tp) matmul,
    # lane-dense (Tp-wide) store.
    h_last = hist_ref[:, S1 - 1, :]                       # (S0, Hp)
    out_ref[...] = (jnp.dot(h_last, wout_ref[...],
                            preferred_element_type=jnp.float32)
                    + bout_ref[...]).astype(out_ref.dtype)


def simple_lstm_forward(sentence, params):
    """Mirrors SimpleLSTM.forward; returns (S0, tagset_size)."""
    emb_table = params["embedding"]                       # (V, E)
    H = params["w_hh"].shape[1]
    T = params["w_out"].shape[0]
    E = emb_table.shape[1]
    Hp = _round_up(H, 128)                                # lane-dense gate tiles
    Tp = _round_up(T, 128)                                # lane-dense output

    # Gate-blocked, zero-padded weight layouts. Padding is exact: padded hidden
    # lanes receive zero bias / zero weight columns, stay 0 through the
    # recurrence, and multiply zero rows in Whh / Wout.
    wih_g = params["w_ih"].reshape(4, H, E)               # (gate, out_h, e)
    wih_t = (jnp.zeros((4, Hp, E), jnp.float32).at[:, :H, :].set(wih_g)
             .transpose(2, 0, 1).reshape(E, 4 * Hp))
    whh_g = params["w_hh"].reshape(4, H, H)               # (gate, out_h, in_h)
    whh_t = (jnp.zeros((4, Hp, Hp), jnp.float32).at[:, :H, :H].set(whh_g)
             .transpose(2, 0, 1).reshape(Hp, 4 * Hp))
    b_g = (params["b_ih"] + params["b_hh"]).reshape(4, H)
    bias = (jnp.zeros((4, Hp), jnp.float32).at[:, :H].set(b_g)
            .reshape(1, 4 * Hp))
    wout_t = jnp.zeros((Hp, Tp), jnp.float32).at[:H, :T].set(params["w_out"].T)
    bout = jnp.zeros((1, Tp), jnp.float32).at[0, :T].set(params["b_out"])

    # Embedding gather is JAX glue (no clean rectangular-tile equivalent).
    embeds = emb_table[sentence]                          # (S0, S1, E)
    S0, S1, _ = embeds.shape
    x2 = embeds.reshape(S0 * S1, E).astype(jnp.float32)

    kernel = functools.partial(_lstm_kernel, unroll=bool(S0 <= 32))

    out = pl.pallas_call(
        kernel,
        out_shape=jax.ShapeDtypeStruct((S0, Tp), jnp.float32),
        grid_spec=pltpu.PrefetchScalarGridSpec(
            num_scalar_prefetch=0,
            grid=(1,),                                    # single invocation
            in_specs=[
                pl.BlockSpec((S0 * S1, E), lambda i: (0, 0)),
                pl.BlockSpec((E, 4 * Hp), lambda i: (0, 0)),
                pl.BlockSpec((Hp, 4 * Hp), lambda i: (0, 0)),
                pl.BlockSpec((1, 4 * Hp), lambda i: (0, 0)),
                pl.BlockSpec((Hp, Tp), lambda i: (0, 0)),
                pl.BlockSpec((1, Tp), lambda i: (0, 0)),
            ],
            out_specs=pl.BlockSpec((S0, Tp), lambda i: (0, 0)),
            scratch_shapes=[
                pltpu.VMEM((S0, S1, 4 * Hp), jnp.float32),   # hoisted gates_x
                pltpu.VMEM((S0, S1, Hp), jnp.float32),       # hidden history
            ],
        ),
        compiler_params=pltpu.CompilerParams(
            dimension_semantics=("arbitrary",)),          # serial recurrence
    )(x2, wih_t, whh_t, bias, wout_t, bout)

    return out[:, :T]                                     # (S0, tagset_size)


def reference_forward(sentence, params):
    """Pure-JAX reference of the same semantics (for verification)."""
    embeds = params["embedding"][sentence]                # (S0, S1, E)
    S0, S1, _ = embeds.shape
    H = params["w_hh"].shape[1]

    def step(carry, x_t):
        h, c = carry
        gates = (x_t @ params["w_ih"].T + params["b_ih"]
                 + h @ params["w_hh"].T + params["b_hh"])
        i_g = jax.nn.sigmoid(gates[:, 0 * H:1 * H])
        f_g = jax.nn.sigmoid(gates[:, 1 * H:2 * H])
        g_g = jnp.tanh(gates[:, 2 * H:3 * H])
        o_g = jax.nn.sigmoid(gates[:, 3 * H:4 * H])
        c = f_g * c + i_g * g_g
        h = o_g * jnp.tanh(c)
        return (h, c), h

    h0 = jnp.zeros((S1, H), jnp.float32)
    c0 = jnp.zeros((S1, H), jnp.float32)
    _, lstm_out = lax.scan(step, (h0, c0), embeds)        # (S0, S1, H)
    tag_space = lstm_out @ params["w_out"].T + params["b_out"]
    return tag_space[:, -1, :]


def init_params(key, vocab_size, embedding_dim, hidden_dim, tagset_size):
    ks = jax.random.split(key, 7)
    s = 1.0 / jnp.sqrt(hidden_dim)
    return {
        "embedding": jax.random.normal(ks[0], (vocab_size, embedding_dim),
                                       jnp.float32),
        "w_ih": jax.random.uniform(ks[1], (4 * hidden_dim, embedding_dim),
                                   jnp.float32, -s, s),
        "w_hh": jax.random.uniform(ks[2], (4 * hidden_dim, hidden_dim),
                                   jnp.float32, -s, s),
        "b_ih": jax.random.uniform(ks[3], (4 * hidden_dim,), jnp.float32, -s, s),
        "b_hh": jax.random.uniform(ks[4], (4 * hidden_dim,), jnp.float32, -s, s),
        "w_out": jax.random.uniform(ks[5], (tagset_size, hidden_dim),
                                    jnp.float32, -s, s),
        "b_out": jax.random.uniform(ks[6], (tagset_size,), jnp.float32, -s, s),
    }


if __name__ == "__main__":
    vocab_size = 50
    embedding_dim = 16
    hidden_dim = 32
    tagset_size = 8
    S0, S1 = 2, 8          # sentence: [2, 8] int token ids

    key = jax.random.PRNGKey(0)
    pkey, skey = jax.random.split(key)
    params = init_params(pkey, vocab_size, embedding_dim, hidden_dim,
                         tagset_size)
    sentence = jax.random.randint(skey, (S0, S1), 0, vocab_size, jnp.int32)

    out = simple_lstm_forward(sentence, params)
    out = jax.block_until_ready(out)

    ref = jax.block_until_ready(reference_forward(sentence, params))
    assert out.shape == (S0, tagset_size), out.shape
    assert jnp.allclose(out, ref, atol=1e-4, rtol=1e-4), \
        f"max err {jnp.max(jnp.abs(out - ref))}"

    # TODO(synk): for v7x with large batch (S1), split S1 across the two
    # TensorCores with a leading "parallel" grid axis; not worth it at S1=8.
    print("KERNEL_OK")
</pallas_src>

<mosaic_0001>
module attributes {stable_mosaic.version = 11 : i64} {
  func.func @_lstm_kernel(%arg0: i32, %arg1: memref<16x16xf32, #tpu.memory_space<vmem>>, %arg2: memref<16x512xf32, #tpu.memory_space<vmem>>, %arg3: memref<128x512xf32, #tpu.memory_space<vmem>>, %arg4: memref<1x512xf32, #tpu.memory_space<vmem>>, %arg5: memref<128x128xf32, #tpu.memory_space<vmem>>, %arg6: memref<1x128xf32, #tpu.memory_space<vmem>>, %arg7: memref<2x128xf32, #tpu.memory_space<vmem>>, %arg8: memref<2x8x512xf32, #tpu.memory_space<vmem>>, %arg9: memref<2x8x128xf32, #tpu.memory_space<vmem>>) attributes {dimension_semantics = [#tpu.dimension_semantics<arbitrary>], iteration_bounds = array<i64: 1>, scalar_prefetch = 0 : i64, scratch_operands = 2 : i64, tpu.core_type = #tpu.core_type<tc>, window_params = [{pipeline_mode = #tpu.pipeline_mode<synchronous>, transform_indices = @transform_0, window_bounds = array<i64: 16, 16>}, {pipeline_mode = #tpu.pipeline_mode<synchronous>, transform_indices = @transform_1, window_bounds = array<i64: 16, 512>}, {pipeline_mode = #tpu.pipeline_mode<synchronous>, transform_indices = @transform_2, window_bounds = array<i64: 128, 512>}, {pipeline_mode = #tpu.pipeline_mode<synchronous>, transform_indices = @transform_3, window_bounds = array<i64: 1, 512>}, {pipeline_mode = #tpu.pipeline_mode<synchronous>, transform_indices = @transform_4, window_bounds = array<i64: 128, 128>}, {pipeline_mode = #tpu.pipeline_mode<synchronous>, transform_indices = @transform_5, window_bounds = array<i64: 1, 128>}, {pipeline_mode = #tpu.pipeline_mode<synchronous>, transform_indices = @transform_6, window_bounds = array<i64: 2, 128>}]} {
    %c0 = arith.constant 0 : index
    %c0_0 = arith.constant 0 : index
    %0 = vector.load %arg1[%c0, %c0_0] : memref<16x16xf32, #tpu.memory_space<vmem>>, vector<16x16xf32>
    %c0_1 = arith.constant 0 : index
    %c0_2 = arith.constant 0 : index
    %1 = vector.load %arg2[%c0_1, %c0_2] : memref<16x512xf32, #tpu.memory_space<vmem>>, vector<16x512xf32>
    %cst = arith.constant dense<0.000000e+00> : vector<16x512xf32>
    %2 = tpu.matmul %0, %1, %cst {dimension_numbers = #tpu.dot_dimension_numbers<[1], [0], [0], [1], [0, 0, 1, 1], [], []>} : vector<16x16xf32>, vector<16x512xf32>, vector<16x512xf32> -> vector<16x512xf32>
    %c0_3 = arith.constant 0 : index
    %c0_4 = arith.constant 0 : index
    %3 = vector.load %arg4[%c0_3, %c0_4] : memref<1x512xf32, #tpu.memory_space<vmem>>, vector<1x512xf32>
    %4 = vector.broadcast %3 : vector<1x512xf32> to vector<16x512xf32>
    %5 = arith.addf %2, %4 : vector<16x512xf32>
    %6 = vector.shape_cast %5 : vector<16x512xf32> to vector<2x8x512xf32>
    %c0_5 = arith.constant 0 : index
    %c0_6 = arith.constant 0 : index
    %c0_7 = arith.constant 0 : index
    %7 = vector.load %arg8[%c0_5, %c0_6, %c0_7] : memref<2x8x512xf32, #tpu.memory_space<vmem>>, vector<2x8x512xf32>
    tpu.vector_store %arg8[%c0_5, %c0_6, %c0_7], %6 {strides = array<i32>} : memref<2x8x512xf32, #tpu.memory_space<vmem>>, vector<2x8x512xf32>,
    %cst_8 = arith.constant 0.000000e+00 : f32
    %8 = vector.broadcast %cst_8 : f32 to vector<8x128xf32>
    %cst_9 = arith.constant 0.000000e+00 : f32
    %9 = vector.broadcast %cst_9 : f32 to vector<8x128xf32>
    %c0_i32 = arith.constant 0 : i32
    %10 = arith.index_cast %c0_i32 : i32 to index
    %c0_10 = arith.constant 0 : index
    %c0_11 = arith.constant 0 : index
    %11 = vector.load %arg8[%10, %c0_10, %c0_11] : memref<2x8x512xf32, #tpu.memory_space<vmem>>, vector<1x8x512xf32>
    %12 = vector.shape_cast %11 : vector<1x8x512xf32> to vector<8x512xf32>
    %c0_12 = arith.constant 0 : index
    %c0_13 = arith.constant 0 : index
    %13 = vector.load %arg3[%c0_12, %c0_13] : memref<128x512xf32, #tpu.memory_space<vmem>>, vector<128x512xf32>
    %cst_14 = arith.constant dense<0.000000e+00> : vector<8x512xf32>
    %14 = tpu.matmul %8, %13, %cst_14 {dimension_numbers = #tpu.dot_dimension_numbers<[1], [0], [0], [1], [0, 0, 1, 1], [], []>} : vector<8x128xf32>, vector<128x512xf32>, vector<8x512xf32> -> vector<8x512xf32>
    %15 = arith.addf %12, %14 : vector<8x512xf32>
    %16 = vector.extract_strided_slice %15 {offsets = [0, 0], sizes = [8, 128], strides = [1, 1]} : vector<8x512xf32> to vector<8x128xf32>
    %17 = arith.negf %16 : vector<8x128xf32>
    %18 = math.exp %17 : vector<8x128xf32>
    %cst_15 = arith.constant 1.000000e+00 : f32
    %19 = vector.broadcast %cst_15 : f32 to vector<8x128xf32>
    %20 = arith.addf %19, %18 : vector<8x128xf32>
    %21 = arith.divf %19, %20 : vector<8x128xf32>
    %22 = vector.extract_strided_slice %15 {offsets = [0, 128], sizes = [8, 128], strides = [1, 1]} : vector<8x512xf32> to vector<8x128xf32>
    %23 = arith.negf %22 : vector<8x128xf32>
    %24 = math.exp %23 : vector<8x128xf32>
    %cst_16 = arith.constant 1.000000e+00 : f32
    %25 = vector.broadcast %cst_16 : f32 to vector<8x128xf32>
    %26 = arith.addf %25, %24 : vector<8x128xf32>
    %27 = arith.divf %25, %26 : vector<8x128xf32>
    %28 = vector.extract_strided_slice %15 {offsets = [0, 256], sizes = [8, 128], strides = [1, 1]} : vector<8x512xf32> to vector<8x128xf32>
    %29 = math.tanh %28 : vector<8x128xf32>
    %30 = vector.extract_strided_slice %15 {offsets = [0, 384], sizes = [8, 128], strides = [1, 1]} : vector<8x512xf32> to vector<8x128xf32>
    %31 = arith.negf %30 : vector<8x128xf32>
    %32 = math.exp %31 : vector<8x128xf32>
    %cst_17 = arith.constant 1.000000e+00 : f32
    %33 = vector.broadcast %cst_17 : f32 to vector<8x128xf32>
    %34 = arith.addf %33, %32 : vector<8x128xf32>
    %35 = arith.divf %33, %34 : vector<8x128xf32>
    %36 = arith.mulf %27, %9 : vector<8x128xf32>
    %37 = arith.mulf %21, %29 : vector<8x128xf32>
    %38 = arith.addf %36, %37 : vector<8x128xf32>
    %39 = math.tanh %38 : vector<8x128xf32>
    %40 = arith.mulf %35, %39 : vector<8x128xf32>
    %41 = arith.index_cast %c0_i32 : i32 to index
    %c0_18 = arith.constant 0 : index
    %c0_19 = arith.constant 0 : index
    %42 = vector.load %arg9[%41, %c0_18, %c0_19] : memref<2x8x128xf32, #tpu.memory_space<vmem>>, vector<1x8x128xf32>
    %43 = vector.shape_cast %42 : vector<1x8x128xf32> to vector<8x128xf32>
    %44 = vector.shape_cast %40 : vector<8x128xf32> to vector<1x8x128xf32>
    tpu.vector_store %arg9[%41, %c0_18, %c0_19], %44 {strides = array<i32>} : memref<2x8x128xf32, #tpu.memory_space<vmem>>, vector<1x8x128xf32>,
    %c1_i32 = arith.constant 1 : i32
    %45 = arith.index_cast %c1_i32 : i32 to index
    %c0_20 = arith.constant 0 : index
    %c0_21 = arith.constant 0 : index
    %46 = vector.load %arg8[%45, %c0_20, %c0_21] : memref<2x8x512xf32, #tpu.memory_space<vmem>>, vector<1x8x512xf32>
    %47 = vector.shape_cast %46 : vector<1x8x512xf32> to vector<8x512xf32>
    %c0_22 = arith.constant 0 : index
    %c0_23 = arith.constant 0 : index
    %48 = vector.load %arg3[%c0_22, %c0_23] : memref<128x512xf32, #tpu.memory_space<vmem>>, vector<128x512xf32>
    %cst_24 = arith.constant dense<0.000000e+00> : vector<8x512xf32>
    %49 = tpu.matmul %40, %48, %cst_24 {dimension_numbers = #tpu.dot_dimension_numbers<[1], [0], [0], [1], [0, 0, 1, 1], [], []>} : vector<8x128xf32>, vector<128x512xf32>, vector<8x512xf32> -> vector<8x512xf32>
    %50 = arith.addf %47, %49 : vector<8x512xf32>
    %51 = vector.extract_strided_slice %50 {offsets = [0, 0], sizes = [8, 128], strides = [1, 1]} : vector<8x512xf32> to vector<8x128xf32>
    %52 = arith.negf %51 : vector<8x128xf32>
    %53 = math.exp %52 : vector<8x128xf32>
    %cst_25 = arith.constant 1.000000e+00 : f32
    %54 = vector.broadcast %cst_25 : f32 to vector<8x128xf32>
    %55 = arith.addf %54, %53 : vector<8x128xf32>
    %56 = arith.divf %54, %55 : vector<8x128xf32>
    %57 = vector.extract_strided_slice %50 {offsets = [0, 128], sizes = [8, 128], strides = [1, 1]} : vector<8x512xf32> to vector<8x128xf32>
    %58 = arith.negf %57 : vector<8x128xf32>
    %59 = math.exp %58 : vector<8x128xf32>
    %cst_26 = arith.constant 1.000000e+00 : f32
    %60 = vector.broadcast %cst_26 : f32 to vector<8x128xf32>
    %61 = arith.addf %60, %59 : vector<8x128xf32>
    %62 = arith.divf %60, %61 : vector<8x128xf32>
    %63 = vector.extract_strided_slice %50 {offsets = [0, 256], sizes = [8, 128], strides = [1, 1]} : vector<8x512xf32> to vector<8x128xf32>
    %64 = math.tanh %63 : vector<8x128xf32>
    %65 = vector.extract_strided_slice %50 {offsets = [0, 384], sizes = [8, 128], strides = [1, 1]} : vector<8x512xf32> to vector<8x128xf32>
    %66 = arith.negf %65 : vector<8x128xf32>
    %67 = math.exp %66 : vector<8x128xf32>
    %cst_27 = arith.constant 1.000000e+00 : f32
    %68 = vector.broadcast %cst_27 : f32 to vector<8x128xf32>
    %69 = arith.addf %68, %67 : vector<8x128xf32>
    %70 = arith.divf %68, %69 : vector<8x128xf32>
    %71 = arith.mulf %62, %38 : vector<8x128xf32>
    %72 = arith.mulf %56, %64 : vector<8x128xf32>
    %73 = arith.addf %71, %72 : vector<8x128xf32>
    %74 = math.tanh %73 : vector<8x128xf32>
    %75 = arith.mulf %70, %74 : vector<8x128xf32>
    %76 = arith.index_cast %c1_i32 : i32 to index
    %c0_28 = arith.constant 0 : index
    %c0_29 = arith.constant 0 : index
    %77 = vector.load %arg9[%76, %c0_28, %c0_29] : memref<2x8x128xf32, #tpu.memory_space<vmem>>, vector<1x8x128xf32>
    %78 = vector.shape_cast %77 : vector<1x8x128xf32> to vector<8x128xf32>
    %79 = vector.shape_cast %75 : vector<8x128xf32> to vector<1x8x128xf32>
    tpu.vector_store %arg9[%76, %c0_28, %c0_29], %79 {strides = array<i32>} : memref<2x8x128xf32, #tpu.memory_space<vmem>>, vector<1x8x128xf32>,
    %c2_i32 = arith.constant 2 : i32
    %c0_30 = arith.constant 0 : index
    %c7 = arith.constant 7 : index
    %c0_31 = arith.constant 0 : index
    %80 = vector.load %arg9[%c0_30, %c7, %c0_31] : memref<2x8x128xf32, #tpu.memory_space<vmem>>, vector<2x1x128xf32>
    %81 = vector.shape_cast %80 : vector<2x1x128xf32> to vector<2x128xf32>
    %c0_32 = arith.constant 0 : index
    %c0_33 = arith.constant 0 : index
    %82 = vector.load %arg5[%c0_32, %c0_33] : memref<128x128xf32, #tpu.memory_space<vmem>>, vector<128x128xf32>
    %cst_34 = arith.constant dense<0.000000e+00> : vector<2x128xf32>
    %83 = tpu.matmul %81, %82, %cst_34 {dimension_numbers = #tpu.dot_dimension_numbers<[1], [0], [0], [1], [0, 0, 1, 1], [], []>} : vector<2x128xf32>, vector<128x128xf32>, vector<2x128xf32> -> vector<2x128xf32>
    %c0_35 = arith.constant 0 : index
    %c0_36 = arith.constant 0 : index
    %84 = vector.load %arg6[%c0_35, %c0_36] : memref<1x128xf32, #tpu.memory_space<vmem>>, vector<1x128xf32>
    %85 = vector.broadcast %84 : vector<1x128xf32> to vector<2x128xf32>
    %86 = arith.addf %83, %85 : vector<2x128xf32>
    %c0_37 = arith.constant 0 : index
    %c0_38 = arith.constant 0 : index
    %87 = vector.load %arg7[%c0_37, %c0_38] : memref<2x128xf32, #tpu.memory_space<vmem>>, vector<2x128xf32>
    tpu.vector_store %arg7[%c0_37, %c0_38], %86 {strides = array<i32>} : memref<2x128xf32, #tpu.memory_space<vmem>>, vector<2x128xf32>,
    return
  }
  func.func @transform_0(%arg0: i32) -> (i32, i32) {
    %c0_i32 = arith.constant 0 : i32
    %c0_i32_0 = arith.constant 0 : i32
    %c0_i32_1 = arith.constant 0 : i32
    return %c0_i32, %c0_i32_0 : i32, i32
  }
  func.func @transform_1(%arg0: i32) -> (i32, i32) {
    %c0_i32 = arith.constant 0 : i32
    %c0_i32_0 = arith.constant 0 : i32
    %c0_i32_1 = arith.constant 0 : i32
    return %c0_i32, %c0_i32_0 : i32, i32
  }
  func.func @transform_2(%arg0: i32) -> (i32, i32) {
    %c0_i32 = arith.constant 0 : i32
    %c0_i32_0 = arith.constant 0 : i32
    %c0_i32_1 = arith.constant 0 : i32
    return %c0_i32, %c0_i32_0 : i32, i32
  }
  func.func @transform_3(%arg0: i32) -> (i32, i32) {
    %c0_i32 = arith.constant 0 : i32
    %c0_i32_0 = arith.constant 0 : i32
    %c0_i32_1 = arith.constant 0 : i32
    return %c0_i32, %c0_i32_0 : i32, i32
  }
  func.func @transform_4(%arg0: i32) -> (i32, i32) {
    %c0_i32 = arith.constant 0 : i32
    %c0_i32_0 = arith.constant 0 : i32
    %c0_i32_1 = arith.constant 0 : i32
    return %c0_i32, %c0_i32_0 : i32, i32
  }
  func.func @transform_5(%arg0: i32) -> (i32, i32) {
    %c0_i32 = arith.constant 0 : i32
    %c0_i32_0 = arith.constant 0 : i32
    %c0_i32_1 = arith.constant 0 : i32
    return %c0_i32, %c0_i32_0 : i32, i32
  }
  func.func @transform_6(%arg0: i32) -> (i32, i32) {
    %c0_i32 = arith.constant 0 : i32
    %c0_i32_0 = arith.constant 0 : i32
    %c0_i32_1 = arith.constant 0 : i32
    return %c0_i32, %c0_i32_0 : i32, i32
  }
}

</mosaic_0001>

<bundles_post_ra>
// kernel: tpu_custom_call.1
= control target key start
LH: loop header
LB: loop body
LE: loop exit
PB: predicated region body
PF: predicated region fallthrough
CT: control target
= control target key end

     0   :  { %11 = vsyncpa [#allocation5], 0  ;;  %s1537_s0 = inlined_call_operand.hbm [shape: f32[16,16], index: 0, kind: input, shape index: {}]   ;;  %s1538_s1 = inlined_call_operand.hbm [shape: f32[16,512], index: 1, kind: input, shape index: {}]   ;;  %s1539_s2 = inlined_call_operand.hbm [shape: f32[128,512], index: 2, kind: input, shape index: {}]   ;;  %s1540_s3 = inlined_call_operand.vmem [shape: f32[1,512], index: 3, kind: input, shape index: {}]   ;;  %s1541_s4 = inlined_call_operand.hbm [shape: f32[128,128], index: 4, kind: input, shape index: {}]   ;;  %s1542_s5 = inlined_call_operand.vmem [shape: f32[1,128], index: 5, kind: input, shape index: {}]   ;;  %s1543_s6 = inlined_call_operand.hbm [shape: f32[2,128], index: 6, kind: output, shape index: {}]  }
   0x1   :  { %12 = vsyncpa [#allocation8], 0 }
   0x2   :  { %13 = vsyncpa [#allocation11], 0 }
   0x3   :  { %14 = vsyncpa [#allocation6], 0  ;;  %s1280_s21 = smov [#allocation7]   ;;  %s1162_s25 = scalar_lea.hbm %s1538_s1, 1024 }
   0x4   :  { %s32_s22 = sshll.u32 %s1280_s21, 4  ;;  %p1163_p0 = scmp.ne.s32.totalorder %s1538_s1, %s1162_s25  ;;  %s33_s22 = int_to_ptr.vmem [resolvable:$true] %s32_s22 }
   0x5   :  { %p1166_p1 = scmp.lt.u32.totalorder %s1162_s25, %s1538_s1 }
   0x7   :  { %p1168_p2 = pnand %p1166_p1, %p1163_p0 }
   0x9   :  { %1171 = shalt.err (!%p1168_p2)
}
   0xa   :  { %s1172_s30 = scalar_lea.vmem %s33_s22, 1024  ;;  %p1177_p4 = scmp.lt.s32.totalorder %s33_s22, %s33_s22 }
   0xb   :  { %p1173_p3 = scmp.ne.s32.totalorder %s33_s22, %s1172_s30  ;;  %p1178_p5 = scmp.lt.s32.totalorder %s1172_s30, %s1172_s30 }
   0xd   :  { %p1179_p6 = por %p1178_p5, %p1177_p4 }
   0xf   :  { %p1180_p7 = pnand %p1179_p6, %p1173_p3 }
  0x11   :  { %1183 = shalt.err (!%p1180_p7)
}
  0x12   :  { %s1281_s7 = smov 512   ;;  %s1282_s8 = smov 32  }
  0x13   :  { %38 = dma.hbm_to_vmem [thread:$0]  %s1538_s1, 1024, %s33_s22, [#allocation8], %s1281_s7, %s1281_s7, %s1282_s8  }
  0x14   :  { %s1283_s11 = smov [#allocation4]   ;;  %s1184_s15 = scalar_lea.hbm %s1537_s0, 256 }
  0x15   :  { %s20_s12 = sshll.u32 %s1283_s11, 4  ;;  %p1185_p8 = scmp.ne.s32.totalorder %s1537_s0, %s1184_s15  ;;  %s21_s12 = int_to_ptr.vmem [resolvable:$true] %s20_s12 }
  0x16   :  { %p1188_p9 = scmp.lt.u32.totalorder %s1184_s15, %s1537_s0 }
  0x18   :  { %p1190_p10 = pnand %p1188_p9, %p1185_p8 }
  0x1a   :  { %1193 = shalt.err (!%p1190_p10)
}
  0x1b   :  { %s1194_s20 = scalar_lea.vmem %s21_s12, 256  ;;  %p1199_p12 = scmp.lt.s32.totalorder %s21_s12, %s21_s12 }
  0x1c   :  { %p1195_p11 = scmp.ne.s32.totalorder %s21_s12, %s1194_s20  ;;  %p1200_p13 = scmp.lt.s32.totalorder %s1194_s20, %s1194_s20 }
  0x1e   :  { %p1201_p0 = por %p1200_p13, %p1199_p12 }
  0x20   :  { %p1202_p1 = pnand %p1201_p0, %p1195_p11 }
  0x22   :  { %1205 = shalt.err (!%p1202_p1)
}
  0x23   :  { %s1284_s1 = smov 128   ;;  %s1285_s21 = smov 8  }
  0x24   :  { %26 = dma.hbm_to_vmem [thread:$0]  %s1537_s0, 256, %s21_s12, [#allocation5], %s1284_s1, %s1284_s1, %s1285_s21  }
  0x25   :  { %s1286_s24 = smov [#allocation9]   ;;  %s1287_s26 = smov [#allocation10]  }
  0x26   :  { %s44_s25 = sshll.u32 %s1286_s24, 4  ;;  %s58_s27 = sshll.u32 %s1287_s26, 4  ;;  %s45_s25 = int_to_ptr.vmem [resolvable:$true] %s44_s25  ;;  %s1357_s27 = int_to_ptr.vmem [resolvable:$true] %s58_s27 }
  0x27   :  { %s1206_s30 = scalar_lea.hbm %s1539_s2, 8192 }
  0x28   :  { %p1207_p2 = scmp.ne.s32.totalorder %s1539_s2, %s1206_s30  ;;  %p1210_p3 = scmp.lt.u32.totalorder %s1206_s30, %s1539_s2 }
  0x2a   :  { %p1212_p4 = pnand %p1210_p3, %p1207_p2 }
  0x2c   :  { %1215 = shalt.err (!%p1212_p4)
}
  0x2d   :  { %s1216_s0 = scalar_lea.vmem %s45_s25, 8192  ;;  %p1221_p6 = scmp.lt.s32.totalorder %s45_s25, %s45_s25 }
  0x2e   :  { %p1217_p5 = scmp.ne.s32.totalorder %s45_s25, %s1216_s0  ;;  %p1222_p7 = scmp.lt.s32.totalorder %s1216_s0, %s1216_s0 }
  0x30   :  { %p1223_p8 = por %p1222_p7, %p1221_p6 }
  0x32   :  { %p1224_p9 = pnand %p1223_p8, %p1217_p5 }
  0x34   :  { %1227 = shalt.err (!%p1224_p9)
}
  0x35   :  { %50 = dma.hbm_to_vmem [thread:$0]  %s1539_s2, 8192, %s45_s25, [#allocation8], %s1281_s7, %s1281_s7, %s1282_s8  }
  0x36   :  { %s1228_s17 = scalar_lea.hbm %s1541_s4, 2048 }
  0x37   :  { %p1229_p10 = scmp.ne.s32.totalorder %s1541_s4, %s1228_s17  ;;  %p1232_p11 = scmp.lt.u32.totalorder %s1228_s17, %s1541_s4 }
  0x39   :  { %p1234_p12 = pnand %p1232_p11, %p1229_p10 }
  0x3b   :  { %1237 = shalt.err (!%p1234_p12)
}
  0x3c   :  { %s1238_s23 = scalar_lea.vmem %s1357_s27, 2048  ;;  %p1243_p0 = scmp.lt.s32.totalorder %s1357_s27, %s1357_s27 }
  0x3d   :  { %p1239_p13 = scmp.ne.s32.totalorder %s1357_s27, %s1238_s23  ;;  %p1244_p1 = scmp.lt.s32.totalorder %s1238_s23, %s1238_s23 }
  0x3f   :  { %p1245_p2 = por %p1244_p1, %p1243_p0 }
  0x41   :  { %p1246_p3 = pnand %p1245_p2, %p1239_p13 }
  0x43   :  { %1249 = shalt.err (!%p1246_p3)
}
  0x44   :  { %64 = dma.hbm_to_vmem [thread:$0]  %s1541_s4, 2048, %s1357_s27, [#allocation11], %s1284_s1, %s1284_s1, %s1285_s21  }
  0x45   :  { %1272 = dma.done.wait [#allocation5], 256  }
  0x46   :  { %1273 = vsyncadd [#allocation5], 4294967040 }
  0x47   :  { %1274 = dma.done.wait [#allocation8], 9216  }
  0x48   :  { %1275 = vsyncadd [#allocation8], 4294958080 }
  0x49   :  { %1276 = dma.done.wait [#allocation11], 2048  }
  0x4a   :  { %1277 = vsyncadd [#allocation11], 4294965248  ;;  %v1288_v0 = vmov 0.0   ;;  %v82_v1 = vld [vmem:[#allocation7 + $0x8] sm:$0xff]  ;;  %v81_v6 = vld [vmem:[#allocation7] sm:$0xff]  ;;  %vm111_vm0 = vcmask 130048  }
  0x4b   :  { %182 = vmatprep.mubr.f32.mxu1 %v1288_v0  ;;  %412 = vmatprep.mubr.f32.mxu0 %v1288_v0  ;;  %v86_v2 = vld [vmem:[#allocation7 + $0x28] sm:$0xff]  ;;  %v85_v7 = vld [vmem:[#allocation7 + $0x20] sm:$0xff]  ;;  %v79_v12 = vld [vmem:[#allocation4] sm:$0xff]  ;;  %vm1290_vm1 = vmmov 0   ;;  %vm788_vm2 = vcmask 1041409   ;;  %s1291_s21 = smov [#allocation12]  }
  0x4c   :  { %v285_v3 = vld [vmem:[#allocation9 + $0x8] sm:$0xff]  ;;  %v942_v4 = vpack.c.bf16 %v86_v2, %v82_v1  ;;  %v944_v9 = vpack.c.bf16 %v85_v7, %v81_v6  ;;  %v284_v10 = vld [vmem:[#allocation9] sm:$0xff]  ;;  %v84_v19 = vld [vmem:[#allocation7 + $0x18] sm:$0xff]  ;;  %s868_s24 = sshll.u32 %s1291_s21, 4  ;;  %s869_s24 = int_to_ptr.vmem [resolvable:$true] %s868_s24 }
  0x4d   :  { %v289_v5 = vld [vmem:[#allocation9 + $0x28] sm:$0xff]  ;;  %v288_v11 = vld [vmem:[#allocation9 + $0x20] sm:$0xff]  ;;  %v88_v20 = vld [vmem:[#allocation7 + $0x38] sm:$0xff]  ;;  %s1250_s25 = scalar_lea.vmem %s869_s24, 32  ;;  %p1255_p5 = scmp.lt.s32.totalorder %s869_s24, %s869_s24 }
  0x4e   :  { %v1396_v8 = vpack.c.bf16 %v289_v5, %v285_v3  ;;  %943 = vmatprep.subr.bf16.mxu1 %v942_v4  ;;  %v1398_v13 = vpack.c.bf16 %v288_v11, %v284_v10  ;;  %v293_v14 = vld [vmem:[#allocation9 + $0x48] sm:$0xff]  ;;  %v292_v16 = vld [vmem:[#allocation9 + $0x40] sm:$0xff]  ;;  %v946_v22 = vpack.c.bf16 %v88_v20, %v84_v19  ;;  %v83_v23 = vld [vmem:[#allocation7 + $0x10] sm:$0xff]  ;;  %p1251_p4 = scmp.ne.s32.totalorder %s869_s24, %s1250_s25  ;;  %p1256_p6 = scmp.lt.s32.totalorder %s1250_s25, %s1250_s25 }
  0x4f   :  { %v297_v15 = vld [vmem:[#allocation9 + $0x68] sm:$0xff]  ;;  %945 = vmatpush1.bf16.msra.mxu1 %v944_v9  ;;  %v296_v18 = vld [vmem:[#allocation9 + $0x60] sm:$0xff]  ;;  %v87_v24 = vld [vmem:[#allocation7 + $0x30] sm:$0xff] }
  0x50   :  { %951 = vmatprep.subr.bf16.mxu0 %v1396_v8  ;;  %v1401_v17 = vpack.c.bf16 %v297_v15, %v293_v14  ;;  %v1404_v21 = vpack.c.bf16 %v296_v18, %v292_v16  ;;  %v948_v25 = vpack.c.bf16 %v87_v24, %v83_v23  ;;  %v301_v26 = vld [vmem:[#allocation9 + $0x88] sm:$0xff]  ;;  %v300_v28 = vld [vmem:[#allocation9 + $0x80] sm:$0xff]  ;;  %947 = vmatprep.subr.bf16.mxu1 %v946_v22  ;;  %v287_v31 = vld [vmem:[#allocation9 + $0x18] sm:$0xff]  ;;  %p1257_p7 = por %p1256_p6, %p1255_p5 }
  0x51   :  { %953 = vmatpush1.bf16.msra.mxu0 %v1398_v13  ;;  %v305_v27 = vld [vmem:[#allocation9 + $0xa8] sm:$0xff]  ;;  %v304_v30 = vld [vmem:[#allocation9 + $0xa0] sm:$0xff]  ;;  %v291_v32 = vld [vmem:[#allocation9 + $0x38] sm:$0xff] }
  0x52   :  { %955 = vmatprep.subr.bf16.mxu0 %v1401_v17  ;;  %879 = vmatmul.mubr.msk.f32.vlgmr.msra.gmra.mrb[0].mxu1 %vm111_vm0, %v79_v12  ;;  %v1408_v29 = vpack.c.bf16 %v305_v27, %v301_v26  ;;  %v80_v33 = vld [vmem:[#allocation4 + $0x8] sm:$0xff]  ;;  %v1411_v34 = vpack.c.bf16 %v291_v32, %v287_v31  ;;  %v309_v35 = vld [vmem:[#allocation9 + $0xc8] sm:$0xff]  ;;  %v1414_v37 = vpack.c.bf16 %v304_v30, %v300_v28  ;;  %v286_v38 = vld [vmem:[#allocation9 + $0x10] sm:$0xff]  ;;  %p1258_p8 = pnand %p1257_p7, %p1251_p4 }
  0x53   :  { %188 = vmatprep.mubr.f32.mxu1 %v1288_v0  ;;  %949 = vmatpush1.bf16.msra.mxu1 %v948_v25  ;;  %v313_v36 = vld [vmem:[#allocation9 + $0xe8] sm:$0xff]  ;;  %v290_v39 = vld [vmem:[#allocation9 + $0x30] sm:$0xff]  ;;  %v308_v40 = vld [vmem:[#allocation9 + $0xc0] sm:$0xff] }
  0x54   :  { %983 = vmatprep.subr.bf16.mxu1 %v1411_v34  ;;  %v1418_v41 = vpack.c.bf16 %v313_v36, %v309_v35  ;;  %v312_v42 = vld [vmem:[#allocation9 + $0xe0] sm:$0xff]  ;;  %v295_v43 = vld [vmem:[#allocation9 + $0x58] sm:$0xff]  ;;  %v317_v45 = vld [vmem:[#allocation9 + $0x108] sm:$0xff]  ;;  %v1422_v47 = vpack.c.bf16 %v290_v39, %v286_v38 }
  0x55   :  { %957 = vmatpush1.bf16.msra.mxu0 %v1404_v21  ;;  %v299_v44 = vld [vmem:[#allocation9 + $0x78] sm:$0xff]  ;;  %v321_v46 = vld [vmem:[#allocation9 + $0x128] sm:$0xff]  ;;  %v1425_v48 = vpack.c.bf16 %v312_v42, %v308_v40  ;;  %v294_v50 = vld [vmem:[#allocation9 + $0x50] sm:$0xff] }
  0x56   :  { %959 = vmatprep.subr.bf16.mxu0 %v1408_v29  ;;  %880 = vmatmul.mubr.msk.f32.gmra.mrb[2].mxu1 %vm111_vm0, %v80_v33  ;;  %v1427_v49 = vpack.c.bf16 %v299_v44, %v295_v43  ;;  %v298_v51 = vld [vmem:[#allocation9 + $0x70] sm:$0xff]  ;;  %v316_v52 = vld [vmem:[#allocation9 + $0x100] sm:$0xff]  ;;  %v1430_v53 = vpack.c.bf16 %v321_v46, %v317_v45  ;;  %v303_v55 = vld [vmem:[#allocation9 + $0x98] sm:$0xff] }
  0x57   :  { %259 = vmatprep.mubr.f32.mxu1 %v1288_v0  ;;  %v320_v54 = vld [vmem:[#allocation9 + $0x120] sm:$0xff]  ;;  %v307_v56 = vld [vmem:[#allocation9 + $0xb8] sm:$0xff]  ;;  %v325_v57 = vld [vmem:[#allocation9 + $0x148] sm:$0xff]  ;;  %v1434_v59 = vpack.c.bf16 %v298_v51, %v294_v50 }
  0x58   :  { %v329_v58 = vld [vmem:[#allocation9 + $0x168] sm:$0xff]  ;;  %v1439_v60 = vpack.c.bf16 %v320_v54, %v316_v52  ;;  %v1441_v61 = vpack.c.bf16 %v307_v56, %v303_v55  ;;  %v302_v62 = vld [vmem:[#allocation9 + $0x90] sm:$0xff]  ;;  %v324_v1 = vld [vmem:[#allocation9 + $0x140] sm:$0xff] }
  0x59   :  { %961 = vmatpush1.bf16.msra.mxu0 %v1414_v37  ;;  %v306_v63 = vld [vmem:[#allocation9 + $0xb0] sm:$0xff]  ;;  %v1444_v2 = vpack.c.bf16 %v329_v58, %v325_v57  ;;  %v328_v3 = vld [vmem:[#allocation9 + $0x160] sm:$0xff]  ;;  %v311_v4 = vld [vmem:[#allocation9 + $0xd8] sm:$0xff] }
  0x5a   :  { %963 = vmatprep.subr.bf16.mxu0 %v1418_v41  ;;  %881 = vmatmul.mubr.msk.f32.vlgmr.msra.gmra.mrb[4].mxu1 %vm111_vm0, %v79_v12  ;;  %v315_v5 = vld [vmem:[#allocation9 + $0xf8] sm:$0xff]  ;;  %v333_v6 = vld [vmem:[#allocation9 + $0x188] sm:$0xff]  ;;  %v1448_v9 = vpack.c.bf16 %v306_v63, %v302_v62  ;;  %v1453_v10 = vpack.c.bf16 %v328_v3, %v324_v1  ;;  %v310_v12 = vld [vmem:[#allocation9 + $0xd0] sm:$0xff] }
  0x5b   :  { %985 = vmatpush1.bf16.msra.mxu1 %v1422_v47  ;;  %265 = vmatprep.mubr.f32.mxu1 %v1288_v0  ;;  %v337_v7 = vld [vmem:[#allocation9 + $0x1a8] sm:$0xff]  ;;  %v1455_v11 = vpack.c.bf16 %v315_v5, %v311_v4  ;;  %v314_v14 = vld [vmem:[#allocation9 + $0xf0] sm:$0xff]  ;;  %v332_v15 = vld [vmem:[#allocation9 + $0x180] sm:$0xff] }
  0x5c   :  { %987 = vmatprep.subr.bf16.mxu1 %v1427_v49  ;;  %v1458_v16 = vpack.c.bf16 %v337_v7, %v333_v6  ;;  %v336_v18 = vld [vmem:[#allocation9 + $0x1a0] sm:$0xff]  ;;  %v319_v19 = vld [vmem:[#allocation9 + $0x118] sm:$0xff]  ;;  %v341_v22 = vld [vmem:[#allocation9 + $0x1c8] sm:$0xff]  ;;  %v1461_v24 = vpack.c.bf16 %v314_v14, %v310_v12 }
  0x5d   :  { %965 = vmatpush1.bf16.msra.mxu0 %v1425_v48  ;;  %v323_v20 = vld [vmem:[#allocation9 + $0x138] sm:$0xff]  ;;  %v345_v23 = vld [vmem:[#allocation9 + $0x1e8] sm:$0xff]  ;;  %v1465_v25 = vpack.c.bf16 %v336_v18, %v332_v15  ;;  %v318_v27 = vld [vmem:[#allocation9 + $0x110] sm:$0xff] }
  0x5e   :  { %967 = vmatprep.subr.bf16.mxu0 %v1430_v53  ;;  %882 = vmatmul.mubr.msk.f32.gmra.mrb[6].mxu1 %vm111_vm0, %v80_v33  ;;  %v1467_v26 = vpack.c.bf16 %v323_v20, %v319_v19  ;;  %v322_v28 = vld [vmem:[#allocation9 + $0x130] sm:$0xff]  ;;  %v340_v30 = vld [vmem:[#allocation9 + $0x1c0] sm:$0xff]  ;;  %v978_v31 = vpack.c.bf16 %v345_v23, %v341_v22  ;;  %v327_v33 = vld [vmem:[#allocation9 + $0x158] sm:$0xff] }
  0x5f   :  { %989 = vmatpush1.bf16.msra.mxu1 %v1434_v59  ;;  %483 = vmatprep.mubr.f32.mxu1 %v1288_v0  ;;  %v344_v32 = vld [vmem:[#allocation9 + $0x1e0] sm:$0xff]  ;;  %v331_v35 = vld [vmem:[#allocation9 + $0x178] sm:$0xff]  ;;  %v1000_v36 = vpack.c.bf16 %v322_v28, %v318_v27  ;;  %v326_v40 = vld [vmem:[#allocation9 + $0x150] sm:$0xff] }
  0x60   :  { %991 = vmatprep.subr.bf16.mxu1 %v1441_v61  ;;  %v980_v38 = vpack.c.bf16 %v344_v32, %v340_v30  ;;  %v1002_v39 = vpack.c.bf16 %v331_v35, %v327_v33  ;;  %v330_v42 = vld [vmem:[#allocation9 + $0x170] sm:$0xff]  ;;  %v335_v43 = vld [vmem:[#allocation9 + $0x198] sm:$0xff] }
  0x61   :  { %969 = vmatpush1.bf16.msra.mxu0 %v1439_v60  ;;  %v339_v44 = vld [vmem:[#allocation9 + $0x1b8] sm:$0xff]  ;;  %v1004_v45 = vpack.c.bf16 %v330_v42, %v326_v40  ;;  %v334_v50 = vld [vmem:[#allocation9 + $0x190] sm:$0xff]  ;;  %v1289_v40 = vmov 0.0|0.0  }
  0x62   :  { %971 = vmatprep.subr.bf16.mxu0 %v1444_v2  ;;  %v1006_v46 = vpack.c.bf16 %v339_v44, %v335_v43  ;;  %v338_v51 = vld [vmem:[#allocation9 + $0x1b0] sm:$0xff]  ;;  %v343_v52 = vld [vmem:[#allocation9 + $0x1d8] sm:$0xff] }
  0x63   :  { %993 = vmatpush1.bf16.msra.mxu1 %v1448_v9  ;;  %v347_v54 = vld [vmem:[#allocation9 + $0x1f8] sm:$0xff]  ;;  %v1008_v55 = vpack.c.bf16 %v338_v51, %v334_v50  ;;  %v342_v57 = vld [vmem:[#allocation9 + $0x1d0] sm:$0xff] }
  0x64   :  { %995 = vmatprep.subr.bf16.mxu1 %v1455_v11  ;;  %v1010_v56 = vpack.c.bf16 %v347_v54, %v343_v52  ;;  %v346_v58 = vld [vmem:[#allocation9 + $0x1f0] sm:$0xff]  ;;  %v765_v43 = vld [vmem:[#allocation10 + $0x18] sm:$0xff] }
  0x65   :  { %973 = vmatpush1.bf16.msra.mxu0 %v1453_v10  ;;  %v1012_v62 = vpack.c.bf16 %v346_v58, %v342_v57  ;;  %v764_v42 = vld [vmem:[#allocation10 + $0x10] sm:$0xff]  ;;  %v769_v52 = vld [vmem:[#allocation10 + $0x38] sm:$0xff] }
  0x66   :  { %975 = vmatprep.subr.bf16.mxu0 %v1458_v16  ;;  %v1082_v44 = vpack.c.bf16 %v765_v43, %v764_v42  ;;  %v768_v51 = vld [vmem:[#allocation10 + $0x30] sm:$0xff] }
  0x67   :  { %997 = vmatpush1.bf16.msra.mxu1 %v1461_v24  ;;  %v1088_v54 = vpack.c.bf16 %v769_v52, %v768_v51  ;;  %v772_v58 = vld [vmem:[#allocation10 + $0x50] sm:$0xff] }
  0x68   :  { %999 = vmatprep.subr.bf16.mxu1 %v1467_v26 }
  0x69   :  { %977 = vmatpush1.bf16.msra.mxu0 %v1465_v25 }
  0x6a   :  { %979 = vmatprep.subr.bf16.mxu0 %v978_v31 }
  0x6b   :  { %1001 = vmatpush1.bf16.msra.mxu1 %v1000_v36 }
  0x6c   :  { %1003 = vmatprep.subr.bf16.mxu1 %v1002_v39 }
  0x6d   :  { %981 = vmatpush1.bf16.msra.mxu0 %v980_v38 }
  0x6e   :  { %1015 = vmatprep.subr.bf16.mxu0 %v1396_v8  ;;  %v91_v8 = vlaneseq }
  0x6f   :  { %1005 = vmatpush1.bf16.msra.mxu1 %v1004_v45 }
  0x70   :  { %413 = vmatmul.mubr.f32.vlgmr.msra.gmra.mrb[0].mxu0 %v1288_v0  ;;  %1007 = vmatprep.subr.bf16.mxu1 %v1006_v46 }
  0x71   :  { %1017 = vmatpush1.bf16.msra.mxu0 %v1398_v13  ;;  %652 = vmatprep.mubr.f32.mxu0 %v1288_v0  ;;  %v92_v13 = vshrl.u32 %v91_v8, 7 }
  0x72   :  { %1019 = vmatprep.subr.bf16.mxu0 %v1401_v17 }
  0x73   :  { %1009 = vmatpush1.bf16.msra.mxu1 %v1008_v55  ;;  %v93_v17 = vsub.s32 0, %v92_v13  ;;  %v101_v6 = vsub.s32 2, %v92_v13  ;;  %v105_v7 = vsub.s32 3, %v92_v13 }
  0x74   :  { %1011 = vmatprep.subr.bf16.mxu1 %v1010_v56 }
  0x75   :  { %1021 = vmatpush1.bf16.msra.mxu0 %v1404_v21  ;;  %v89_v21 = vld [vmem:[%s1540_s3] sm:$0xf] }
  0x76   :  { %1023 = vmatprep.subr.bf16.mxu0 %v1408_v29 }
  0x77   :  { %1013 = vmatpush1.bf16.msra.mxu1 %v1012_v62 }
  0x78   :  { %1047 = vmatprep.subr.bf16.mxu1 %v1411_v34  ;;  %v97_v34 = vsub.s32 1, %v92_v13  ;;  %v774_v13 = vld [vmem:[#allocation10 + $0x60] sm:$0xff] }
  0x79   :  { %1025 = vmatpush1.bf16.msra.mxu0 %v1414_v37 }
  0x7a   :  { %1027 = vmatprep.subr.bf16.mxu0 %v1418_v41  ;;  %484 = vmatmul.mubr.f32.vlgmr.msra.gmra.mrb[4].mxu1 %v1288_v0  ;;  %v94_v41 = vrot.slane %v89_v21, %v93_v17  ;;  %v775_v17 = vld [vmem:[#allocation10 + $0x68] sm:$0xff] }
  0x7b   :  { %1049 = vmatpush1.bf16.msra.mxu1 %v1422_v47  ;;  %723 = vmatprep.mubr.f32.mxu1 %v1288_v0  ;;  %v98_v47 = vrot.slane %v89_v21, %v97_v34  ;;  %v777_v34 = vld [vmem:[#allocation10 + $0x78] sm:$0xff] }
  0x7c   :  { %1051 = vmatprep.subr.bf16.mxu1 %v1427_v49 }
  0x7d   :  { %1029 = vmatpush1.bf16.msra.mxu0 %v1425_v48 }
  0x7e   :  { %1031 = vmatprep.subr.bf16.mxu0 %v1430_v53 }
  0x7f   :  { %1053 = vmatpush1.bf16.msra.mxu1 %v1434_v59 }
  0x80   :  { %1055 = vmatprep.subr.bf16.mxu1 %v1441_v61 }
  0x81   :  { %1033 = vmatpush1.bf16.msra.mxu0 %v1439_v60 }
  0x82   :  { %1035 = vmatprep.subr.bf16.mxu0 %v1444_v2 }
  0x83   :  { %1057 = vmatpush1.bf16.msra.mxu1 %v1448_v9  ;;  %v1507_v9 = vrot.slane %v89_v21, %v101_v6 }
  0x84   :  { %1059 = vmatprep.subr.bf16.mxu1 %v1455_v11 }
  0x85   :  { %1037 = vmatpush1.bf16.msra.mxu0 %v1453_v10  ;;  %v1509_v10 = vrot.slane %v89_v21, %v105_v7  ;;  %v1097_v21 = vpack.c.bf16 %v775_v17, %v774_v13 }
  0x86   :  { %1039 = vmatprep.subr.bf16.mxu0 %v1458_v16 }
  0x87   :  { %1061 = vmatpush1.bf16.msra.mxu1 %v1461_v24 }
  0x88   :  { %1063 = vmatprep.subr.bf16.mxu1 %v1467_v26 }
  0x89   :  { %1041 = vmatpush1.bf16.msra.mxu0 %v1465_v25 }
  0x8a   :  { %1043 = vmatprep.subr.bf16.mxu0 %v978_v31 }
  0x8b   :  { %1065 = vmatpush1.bf16.msra.mxu1 %v1000_v36  ;;  %v762_v36 = vld [vmem:[#allocation10] sm:$0xff] }
  0x8c   :  { %1067 = vmatprep.subr.bf16.mxu1 %v1002_v39 }
  0x8d   :  { %1045 = vmatpush1.bf16.msra.mxu0 %v980_v38  ;;  %v763_v38 = vld [vmem:[#allocation10 + $0x8] sm:$0xff] }
  0x8e   :  { %v1079_v39 = vpack.c.bf16 %v763_v38, %v762_v36  ;;  %1078 = vmatprep.subr.bf16.mxu0 %v1289_v40 }
  0x8f   :  { %1069 = vmatpush1.bf16.msra.mxu1 %v1004_v45  ;;  %v766_v45 = vld [vmem:[#allocation10 + $0x20] sm:$0xff] }
  0x90   :  { %1071 = vmatprep.subr.bf16.mxu1 %v1006_v46  ;;  %v767_v46 = vld [vmem:[#allocation10 + $0x28] sm:$0xff] }
  0x91   :  { %v1085_v50 = vpack.c.bf16 %v767_v46, %v766_v45 }
  0x93   :  { %1073 = vmatpush1.bf16.msra.mxu1 %v1008_v55  ;;  %v770_v55 = vld [vmem:[#allocation10 + $0x40] sm:$0xff] }
  0x94   :  { %1075 = vmatprep.subr.bf16.mxu1 %v1010_v56  ;;  %v771_v56 = vld [vmem:[#allocation10 + $0x48] sm:$0xff] }
  0x95   :  { %v1091_v57 = vpack.c.bf16 %v771_v56, %v770_v55 }
  0x97   :  { %1077 = vmatpush1.bf16.msra.mxu1 %v1012_v62  ;;  %v773_v62 = vld [vmem:[#allocation10 + $0x58] sm:$0xff] }
  0x98   :  { %v1094_v8 = vpack.c.bf16 %v773_v62, %v772_v58 }
 0x125   :  { %v184_v29 = vpop.f32.mrb[0].mxu1 }
 0x126   :  { %v186_v37 = vpop.f32.mrb[1].mxu1  ;;  %v185_v60 = vadd.f32 %v184_v29, %v94_v41  ;;  %v776_v29 = vld [vmem:[#allocation10 + $0x70] sm:$0xff] }
 0x127   :  { %v187_v61 = vadd.f32 %v186_v37, %v98_v47  ;;  %v1100_v37 = vpack.c.bf16 %v777_v34, %v776_v29 }
 0x129   :  { %v190_v48 = vpop.f32.mrb[2].mxu1 }
 0x12a   :  { %v1503_v49 = vadd.f32 %v190_v48, %v94_v41  ;;  %v192_v53 = vpop.f32.mrb[3].mxu1 }
 0x12b   :  { %v1505_v59 = vadd.f32 %v192_v53, %v98_v47 }
 0x143   :  { %v414_v63 = vpop.f32.mrb[0].mxu0 }
 0x144   :  { %v490_v1 = vadd.f32 %v414_v63, %v185_v60  ;;  %v416_v2 = vpop.f32.mrb[1].mxu0 }
 0x145   :  { %v491_v3 = vadd.f32 %v416_v2, %v187_v61 }
 0x146   :  { %v883_v4 = vmul.f32 -1.442695, %v490_v1 }
 0x147   :  { %v884_v5 = vmul.f32 -1.442695, %v491_v3 }
 0x148   :  { %1130 = vpow2.f32 %v883_v4 }
 0x149   :  { %1132 = vpow2.f32 %v884_v5 }
 0x14d   :  { %v485_v11 = vpop.f32.mrb[4].mxu1 }
 0x14e   :  { %v1110_v12 = vadd.f32 %v485_v11, %v1507_v9  ;;  %v487_v14 = vpop.f32.mrb[5].mxu1 }
 0x14f   :  { %v1111_v15 = vadd.f32 %v487_v14, %v1509_v10 }
 0x150   :  { %1134 = vtanh.f32 %v1110_v12 }
 0x151   :  { %v885_v18 = vmul.f32 -1.442695, %v1111_v15 }
 0x152   :  { %v1131_v16 = vpop.eup %1130 }
 0x153   :  { %v1133_v19 = vpop.eup %1132  ;;  %v497_v20 = vadd.f32 1.0, %v1131_v16  ;;  %1136 = vpow2.f32 %v885_v18 }
 0x154   :  { %v503_v22 = vadd.f32 1.0, %v1133_v19 }
 0x155   :  { %1138 = vrcp.f32 %v497_v20 }
 0x156   :  { %1140 = vrcp.f32 %v503_v22 }
 0x15a   :  { %v1135_v23 = vpop.eup %1134 }
 0x15d   :  { %v1137_v24 = vpop.eup %1136 }
 0x15e   :  { %v510_v28 = vadd.f32 1.0, %v1137_v24 }
 0x15f   :  { %v1139_v25 = vpop.eup %1138 }
 0x160   :  { %v1141_v26 = vpop.eup %1140  ;;  %v514_v27 = vmul.f32 %v1139_v25, %v1135_v23  ;;  %1142 = vrcp.f32 %v510_v28  ;;  %v889_v25 = vld [vmem:[%s1542_s5] ss:$0 sm:$0xff] }
 0x161   :  { %v513_v30 = vmul.f32 0.0, %v1141_v26 }
 0x163   :  { %v1513_v31 = vadd.f32 %v514_v27, %v513_v30 }
 0x165   :  { %1144 = vtanh.f32 %v1513_v31 }
 0x16a   :  { %v1143_v32 = vpop.eup %1142 }
 0x16f   :  { %v1145_v33 = vpop.eup %1144 }
 0x170   :  { %v517_v35 = vmul.f32 %v1145_v33, %v1143_v32 }
 0x172   :  { %518 = vst [vmem:[#allocation3] sm:$0xff] %v517_v35  ;;  %653 = vmatmul.mubr.f32.vlgmr.msra.gmra.mrb[2].mxu0 %v517_v35  ;;  %724 = vmatmul.mubr.f32.vlgmr.msra.gmra.mrb[6].mxu1 %v517_v35 }
 0x173   :  { %1080 = vmatpush3.bf16.msra.mxu0 %v1079_v39  ;;  %939 = vmatprep.mubr.msk.f32.mxu0 %vm1290_vm1, %v1288_v0 }
 0x174   :  { %1081 = vmatprep.subr.bf16.mxu0 %v1289_v40 }
 0x177   :  { %1083 = vmatpush3.bf16.msra.mxu0 %v1082_v44 }
 0x178   :  { %1084 = vmatprep.subr.bf16.mxu0 %v1289_v40 }
 0x179   :  { %v760_v23 = vld [vmem:[#allocation3 + $0x7] sm:$0x1] }
 0x17b   :  { %1086 = vmatpush3.bf16.msra.mxu0 %v1085_v50 }
 0x17c   :  { %1087 = vmatprep.subr.bf16.mxu0 %v1289_v40 }
 0x17f   :  { %1089 = vmatpush3.bf16.msra.mxu0 %v1088_v54 }
 0x180   :  { %1090 = vmatprep.subr.bf16.mxu0 %v1289_v40 }
 0x183   :  { %1092 = vmatpush3.bf16.msra.mxu0 %v1091_v57 }
 0x184   :  { %1093 = vmatprep.subr.bf16.mxu0 %v1289_v40 }
 0x187   :  { %1095 = vmatpush3.bf16.msra.mxu0 %v1094_v8 }
 0x188   :  { %1096 = vmatprep.subr.bf16.mxu0 %v1289_v40 }
 0x18b   :  { %1098 = vmatpush3.bf16.msra.mxu0 %v1097_v21 }
 0x18c   :  { %1099 = vmatprep.subr.bf16.mxu0 %v1289_v40 }
 0x18f   :  { %1101 = vmatpush3.bf16.msra.mxu0 %v1100_v37 }
 0x245   :  { %v654_v41 = vpop.f32.mrb[2].mxu0  ;;  %v725_v47 = vpop.f32.mrb[6].mxu1 }
 0x246   :  { %v730_v48 = vadd.f32 %v654_v41, %v1503_v49  ;;  %v656_v53 = vpop.f32.mrb[3].mxu0  ;;  %v727_v60 = vpop.f32.mrb[7].mxu1  ;;  %v1112_v3 = vadd.f32 %v725_v47, %v1507_v9 }
 0x247   :  { %v731_v61 = vadd.f32 %v656_v53, %v1505_v59  ;;  %v1113_v0 = vadd.f32 %v727_v60, %v1509_v10 }
 0x248   :  { %v886_v63 = vmul.f32 -1.442695, %v730_v48 }
 0x249   :  { %v887_v1 = vmul.f32 -1.442695, %v731_v61  ;;  %v888_v2 = vmul.f32 -1.442695, %v1113_v0 }
 0x24a   :  { %1146 = vpow2.f32 %v886_v63 }
 0x24b   :  { %1148 = vpow2.f32 %v887_v1 }
 0x24c   :  { %1150 = vpow2.f32 %v888_v2 }
 0x24d   :  { %1152 = vtanh.f32 %v1112_v3 }
 0x254   :  { %v1147_v4 = vpop.eup %1146 }
 0x255   :  { %v1149_v5 = vpop.eup %1148  ;;  %v737_v6 = vadd.f32 1.0, %v1147_v4 }
 0x256   :  { %v743_v7 = vadd.f32 1.0, %v1149_v5  ;;  %v1151_v49 = vpop.eup %1150 }
 0x257   :  { %1154 = vrcp.f32 %v737_v6  ;;  %v1153_v11 = vpop.eup %1152  ;;  %v750_v15 = vadd.f32 1.0, %v1151_v49 }
 0x258   :  { %1156 = vrcp.f32 %v743_v7 }
 0x259   :  { %1158 = vrcp.f32 %v750_v15 }
 0x261   :  { %v1155_v59 = vpop.eup %1154 }
 0x262   :  { %v1157_v12 = vpop.eup %1156  ;;  %v754_v14 = vmul.f32 %v1155_v59, %v1153_v11 }
 0x263   :  { %v753_v16 = vmul.f32 %v1157_v12, %v1513_v31  ;;  %v1159_v9 = vpop.eup %1158 }
 0x265   :  { %v755_v10 = vadd.f32 %v754_v14, %v753_v16 }
 0x267   :  { %1160 = vtanh.f32 %v755_v10 }
 0x271   :  { %v1161_v18 = vpop.eup %1160 }
 0x272   :  { %v757_v19 = vmul.f32 %v1161_v18, %v1159_v9 }
 0x274   :  { %759 = vst [vmem:[#allocation3 + $0x8] sm:$0xff] %v757_v19 }
 0x27b   :  { %v761_v20 = vld [vmem:[#allocation3 + $0xf] sm:$0x1] }
 0x27c   :  { %v787_v22 = vrot.slane %v761_v20, 7 }
 0x27e   :  { %v789_v24 = vsel %vm788_vm2, %v787_v22, %v760_v23 }
 0x27f   :  { %940 = vmatmul.mubr.f32.vlgmr.msra.gmra.mrb[4].mxu0 %v789_v24 }
 0x352   :  { %v857_v26 = vpop.f32.mrb[4].mxu0 }
 0x353   :  { %v858_v27 = vadd.f32 %v889_v25, %v857_v26  ;;  %v941_v28 = vpop.f32.mrb[5].mxu0 }
 0x355   :  { %861 = vst [vmem:[#allocation12] sm:$0x3] %v858_v27 }
 0x356   :  { %1261 = shalt.err (!%p1258_p8)
}
 0x357   :  { %s1262_s28 = scalar_lea.hbm %s1543_s6, 32 }
 0x358   :  { %p1263_p9 = scmp.ne.s32.totalorder %s1543_s6, %s1262_s28  ;;  %p1266_p10 = scmp.lt.u32.totalorder %s1262_s28, %s1543_s6 }
 0x35a   :  { %p1268_p11 = pnand %p1266_p10, %p1263_p9 }
 0x35c   :  { %1271 = shalt.err (!%p1268_p11)
}
 0x35d   :  { %871 = dma.vmem_to_hbm [thread:$0]  %s869_s24, 32, %s1543_s6, [#allocation6]  }
 0x35e   :  { %1278 = dma.done.wait [#allocation6], 32  }
 0x35f   :  { %1279 = vsyncadd [#allocation6], 4294967264 }
 0x360   :  { %875 = vsyncpa [#allocation5], 1 }
 0x361   :  { %876 = vsyncpa [#allocation8], 1 }
 0x362   :  { %877 = vsyncpa [#allocation11], 1 }
 0x363   :  { %878 = vsyncpa [#allocation6], 1 }

</bundles_post_ra>
